<compile_context>
chip_gen: v5e
topology: v5e:2x2
jax: 0.10.0
libtpu: 0.0.40
codegen_flags: <defaults>
</compile_context>

<pallas_src>
import jax
import jax.numpy as jnp
from jax.experimental import pallas as pl
from jax.experimental.pallas import tpu as pltpu


def _outconv_kernel(x_ref, w_ref, b_ref, o_ref):
    # x_ref: (bN, C_in, T)   w_ref: (C_out, C_in)   b_ref: (C_out, 1)
    # o_ref: (bN, C_out, T)
    bN, C_in, _ = x_ref.shape
    w = w_ref[...].astype(jnp.float32)        # (C_out, C_in)
    b = b_ref[...].astype(jnp.float32)        # (C_out, 1) -> broadcasts over lanes
    for i in range(bN):                        # small static unroll over samples
        xi = x_ref[i].astype(jnp.float32)      # (C_in, T)
        # Unrolled VPU FMA over C_in: (C_out,1) * (1,T) broadcast multiplies.
        acc = w[:, 0:1] * xi[0:1, :]
        for c in range(1, C_in):
            acc = acc + w[:, c:c + 1] * xi[c:c + 1, :]
        o_ref[i] = jnp.tanh(acc + b).astype(o_ref.dtype)


def _largest_divisor_leq(n, cap):
    cap = int(max(1, min(cap, n)))
    for d in range(cap, 0, -1):
        if n % d == 0:
            return d
    return 1


def outconv_forward(x_nchw, weight, bias, *, max_tile_pixels=65536,
                    vmem_step_budget=8 * 1024 * 1024):
    """1x1 conv + tanh == nn.Conv2d(C_in, C_out, kernel_size=1) -> Tanh.

    x_nchw : (N, C_in, H, W)
    weight : (C_out, C_in, 1, 1)   (PyTorch Conv2d weight layout)
    bias   : (C_out,)
    returns (N, C_out, H, W)
    """
    N, C_in, H, W = x_nchw.shape
    C_out = weight.shape[0]
    HW = H * W
    itemsize = x_nchw.dtype.itemsize

    # ---- pixel tiling ------------------------------------------------------
    max_tile_pixels = max(128, (int(max_tile_pixels) // 128) * 128)
    if HW <= max_tile_pixels:
        # Full-extent pixel block: no 128-divisibility requirement, no pad.
        pix_tile, n_pix_tiles, HW_pad = HW, 1, HW
    else:
        n_pix_tiles = pl.cdiv(HW, max_tile_pixels)
        pix_tile = pl.cdiv(pl.cdiv(HW, n_pix_tiles), 128) * 128
        HW_pad = n_pix_tiles * pix_tile
        if HW % 128 == 0:
            # Snap to an exact 128-multiple divisor to avoid any pad/slice,
            # as long as the tile stays reasonably large.
            d = _largest_divisor_leq(HW // 128, max_tile_pixels // 128)
            if d * 128 * 2 >= pix_tile:
                pix_tile = d * 128
                n_pix_tiles = HW // pix_tile
                HW_pad = HW

    # ---- batch blocking (amortizes per-step overhead on small images) ------
    per_sample_step_bytes = 2 * (C_in + C_out) * pix_tile * itemsize  # 2x: dbl-buf
    bn_cap = max(1, vmem_step_budget // per_sample_step_bytes)
    if n_pix_tiles == 1 and N >= 2:
        bn_cap = min(bn_cap, N // 2)   # keep >= 2 parallel steps (v7x: 2 TCs)
    bN = _largest_divisor_leq(N, bn_cap)

    # ---- operands ------------------------------------------------------------
    x = x_nchw.reshape(N, C_in, HW)
    if HW_pad != HW:
        # Rare path: large, non-128-divisible H*W; pad is < n_pix_tiles*128 px.
        # TODO(synk): replace with an in-kernel masked tail store to drop the
        # extra pad/slice HBM pass entirely.
        x = jnp.pad(x, ((0, 0), (0, 0), (0, HW_pad - HW)))
    w_mat = weight.reshape(C_out, C_in)   # (C_out, C_in)
    b_col = bias.reshape(C_out, 1)        # (C_out, 1)

    grid = (N // bN, n_pix_tiles)

    cost = pl.CostEstimate(
        flops=2 * N * HW_pad * C_in * C_out,
        transcendentals=N * HW_pad * C_out,
        bytes_accessed=(N * C_in * HW_pad + C_out * C_in + C_out
                        + N * C_out * HW_pad) * itemsize,
    )

    out = pl.pallas_call(
        _outconv_kernel,
        out_shape=jax.ShapeDtypeStruct((N, C_out, HW_pad), x.dtype),
        grid_spec=pltpu.PrefetchScalarGridSpec(
            num_scalar_prefetch=0,
            grid=grid,
            in_specs=[
                pl.BlockSpec((bN, C_in, pix_tile), lambda n, p: (n, 0, p)),
                pl.BlockSpec((C_out, C_in), lambda n, p: (0, 0)),
                pl.BlockSpec((C_out, 1), lambda n, p: (0, 0)),
            ],
            out_specs=pl.BlockSpec((bN, C_out, pix_tile), lambda n, p: (n, 0, p)),
        ),
        compiler_params=pltpu.CompilerParams(
            dimension_semantics=("parallel", "parallel")),
        cost_estimate=cost,
    )(x, w_mat, b_col)

    if HW_pad != HW:
        out = out[:, :, :HW]
    return out.reshape(N, C_out, H, W)


def outconv_reference(x_nchw, weight, bias):
    w_mat = weight.reshape(weight.shape[0], weight.shape[1])  # (C_out, C_in)
    y = jnp.einsum("nchw,oc->nohw", x_nchw, w_mat) + bias[None, :, None, None]
    return jnp.tanh(y)


if __name__ == "__main__":
    key = jax.random.PRNGKey(0)
    k_x, k_w, k_b = jax.random.split(key, 3)

    N, C_in, C_out, H, W = 2, 4, 3, 16, 16

    x = jax.random.normal(k_x, (N, C_in, H, W), dtype=jnp.float32)

    # Deterministic init mimicking nn.Conv2d default: U(-bound, bound),
    # bound = 1/sqrt(fan_in), fan_in = C_in * 1 * 1.
    bound = 1.0 / jnp.sqrt(jnp.float32(C_in))
    weight = jax.random.uniform(
        k_w, (C_out, C_in, 1, 1), dtype=jnp.float32, minval=-bound, maxval=bound)
    bias = jax.random.uniform(
        k_b, (C_out,), dtype=jnp.float32, minval=-bound, maxval=bound)

    out = jax.block_until_ready(outconv_forward(x, weight, bias))

    ref = outconv_reference(x, weight, bias)
    assert out.shape == (N, C_out, H, W)
    assert jnp.allclose(out, ref, atol=1e-5, rtol=1e-5), "mismatch vs reference"

    print("KERNEL_OK")
</pallas_src>

<mosaic_0001>
module attributes {stable_mosaic.version = 11 : i64} {
  func.func @_outconv_kernel(%arg0: i32, %arg1: i32, %arg2: memref<1x4x256xf32, #tpu.memory_space<vmem>>, %arg3: memref<3x4xf32, #tpu.memory_space<vmem>>, %arg4: memref<3x1xf32, #tpu.memory_space<vmem>>, %arg5: memref<1x3x256xf32, #tpu.memory_space<vmem>>) attributes {dimension_semantics = [#tpu.dimension_semantics<parallel>, #tpu.dimension_semantics<parallel>], iteration_bounds = array<i64: 2, 1>, scalar_prefetch = 0 : i64, scratch_operands = 0 : i64, tpu.core_type = #tpu.core_type<tc>, window_params = [{transform_indices = @transform_0, window_bounds = array<i64: 1, 4, 256>}, {pipeline_mode = #tpu.pipeline_mode<synchronous>, transform_indices = @transform_1, window_bounds = array<i64: 3, 4>}, {pipeline_mode = #tpu.pipeline_mode<synchronous>, transform_indices = @transform_2, window_bounds = array<i64: 3, 1>}, {transform_indices = @transform_3, window_bounds = array<i64: 1, 3, 256>}]} {
    %c0 = arith.constant 0 : index
    %c0_0 = arith.constant 0 : index
    %0 = vector.load %arg3[%c0, %c0_0] : memref<3x4xf32, #tpu.memory_space<vmem>>, vector<3x4xf32>
    %c0_1 = arith.constant 0 : index
    %c0_2 = arith.constant 0 : index
    %1 = vector.load %arg4[%c0_1, %c0_2] : memref<3x1xf32, #tpu.memory_space<vmem>>, vector<3x1xf32>
    %c0_3 = arith.constant 0 : index
    %c0_4 = arith.constant 0 : index
    %c0_5 = arith.constant 0 : index
    %2 = vector.load %arg2[%c0_3, %c0_4, %c0_5] : memref<1x4x256xf32, #tpu.memory_space<vmem>>, vector<1x4x256xf32>
    %3 = vector.shape_cast %2 : vector<1x4x256xf32> to vector<4x256xf32>
    %4 = vector.extract_strided_slice %0 {offsets = [0, 0], sizes = [3, 1], strides = [1, 1]} : vector<3x4xf32> to vector<3x1xf32>
    %5 = vector.extract_strided_slice %3 {offsets = [0, 0], sizes = [1, 256], strides = [1, 1]} : vector<4x256xf32> to vector<1x256xf32>
    %6 = vector.broadcast %4 : vector<3x1xf32> to vector<3x256xf32>
    %7 = vector.broadcast %5 : vector<1x256xf32> to vector<3x256xf32>
    %8 = arith.mulf %6, %7 : vector<3x256xf32>
    %9 = vector.extract_strided_slice %0 {offsets = [0, 1], sizes = [3, 1], strides = [1, 1]} : vector<3x4xf32> to vector<3x1xf32>
    %10 = vector.extract_strided_slice %3 {offsets = [1, 0], sizes = [1, 256], strides = [1, 1]} : vector<4x256xf32> to vector<1x256xf32>
    %11 = vector.broadcast %9 : vector<3x1xf32> to vector<3x256xf32>
    %12 = vector.broadcast %10 : vector<1x256xf32> to vector<3x256xf32>
    %13 = arith.mulf %11, %12 : vector<3x256xf32>
    %14 = arith.addf %8, %13 : vector<3x256xf32>
    %15 = vector.extract_strided_slice %0 {offsets = [0, 2], sizes = [3, 1], strides = [1, 1]} : vector<3x4xf32> to vector<3x1xf32>
    %16 = vector.extract_strided_slice %3 {offsets = [2, 0], sizes = [1, 256], strides = [1, 1]} : vector<4x256xf32> to vector<1x256xf32>
    %17 = vector.broadcast %15 : vector<3x1xf32> to vector<3x256xf32>
    %18 = vector.broadcast %16 : vector<1x256xf32> to vector<3x256xf32>
    %19 = arith.mulf %17, %18 : vector<3x256xf32>
    %20 = arith.addf %14, %19 : vector<3x256xf32>
    %21 = vector.extract_strided_slice %0 {offsets = [0, 3], sizes = [3, 1], strides = [1, 1]} : vector<3x4xf32> to vector<3x1xf32>
    %22 = vector.extract_strided_slice %3 {offsets = [3, 0], sizes = [1, 256], strides = [1, 1]} : vector<4x256xf32> to vector<1x256xf32>
    %23 = vector.broadcast %21 : vector<3x1xf32> to vector<3x256xf32>
    %24 = vector.broadcast %22 : vector<1x256xf32> to vector<3x256xf32>
    %25 = arith.mulf %23, %24 : vector<3x256xf32>
    %26 = arith.addf %20, %25 : vector<3x256xf32>
    %27 = vector.broadcast %1 : vector<3x1xf32> to vector<3x256xf32>
    %28 = arith.addf %26, %27 : vector<3x256xf32>
    %29 = math.tanh %28 : vector<3x256xf32>
    %c0_6 = arith.constant 0 : index
    %c0_7 = arith.constant 0 : index
    %c0_8 = arith.constant 0 : index
    %30 = vector.load %arg5[%c0_6, %c0_7, %c0_8] : memref<1x3x256xf32, #tpu.memory_space<vmem>>, vector<1x3x256xf32>
    %31 = vector.shape_cast %30 : vector<1x3x256xf32> to vector<3x256xf32>
    %32 = vector.shape_cast %29 : vector<3x256xf32> to vector<1x3x256xf32>
    tpu.vector_store %arg5[%c0_6, %c0_7, %c0_8], %32 {strides = array<i32>} : memref<1x3x256xf32, #tpu.memory_space<vmem>>, vector<1x3x256xf32>,
    return
  }
  func.func @transform_0(%arg0: i32, %arg1: i32) -> (i32, i32, i32) {
    %c0_i32 = arith.constant 0 : i32
    %c0_i32_0 = arith.constant 0 : i32
    return %arg0, %c0_i32, %arg1 : i32, i32, i32
  }
  func.func @transform_1(%arg0: i32, %arg1: i32) -> (i32, i32) {
    %c0_i32 = arith.constant 0 : i32
    %c0_i32_0 = arith.constant 0 : i32
    %c0_i32_1 = arith.constant 0 : i32
    return %c0_i32, %c0_i32_0 : i32, i32
  }
  func.func @transform_2(%arg0: i32, %arg1: i32) -> (i32, i32) {
    %c0_i32 = arith.constant 0 : i32
    %c0_i32_0 = arith.constant 0 : i32
    %c0_i32_1 = arith.constant 0 : i32
    return %c0_i32, %c0_i32_0 : i32, i32
  }
  func.func @transform_3(%arg0: i32, %arg1: i32) -> (i32, i32, i32) {
    %c0_i32 = arith.constant 0 : i32
    %c0_i32_0 = arith.constant 0 : i32
    return %arg0, %c0_i32, %arg1 : i32, i32, i32
  }
}

</mosaic_0001>

<bundles_post_ra>
// kernel: tpu_custom_call.1
= control target key start
LH: loop header
LB: loop body
LE: loop exit
PB: predicated region body
PF: predicated region fallthrough
CT: control target
= control target key end

     0   :  { %8 = vsyncpa [#allocation3], 0  ;;  %s673_s0 = inlined_call_operand.hbm [shape: f32[2,4,256], index: 0, kind: input, shape index: {}]   ;;  %s674_s1 = inlined_call_operand.vmem [shape: f32[3,4], index: 1, kind: input, shape index: {}]   ;;  %s675_s2 = inlined_call_operand.vmem [shape: f32[3,1], index: 2, kind: input, shape index: {}]   ;;  %s676_s3 = inlined_call_operand.vmem [shape: f32[2,3,256], index: 3, kind: output, shape index: {}]  }
   0x1   :  { %10 = vsyncpa [#allocation3 + $0x1], 0  ;;  %s579_s12 = smov 0   ;;  %s581_s13 = smov 0  }
   0x2   :  { %s583_s14 = smov 0   ;;  %s585_s15 = smov 0  }
   0x3   :  { %s587_s16 = smov 0   ;;  %s589_s17 = smov 0  }
   0x4 LB: > { %s389_s18 = sadd.s32 4294967295, %s553_s17   ;;  %s28_s19 = sadd.s32 1, %s549_s16  ;;  %s553_s17 = sphi %s589_s17, %s16_s17   ;;  %s549_s16 = sphi %s587_s16, %s683_s16   ;;  %s545_s15 = sphi %s585_s15, %s682_s15   ;;  %s541_s14 = sphi %s583_s14, %s681_s14   ;;  %s537_s13 = sphi %s581_s13, %s680_s13   ;;  %s533_s12 = sphi %s579_s12, %s679_s12  }
   0x5   : > { %p30_p0 = scmp.ge.s32.totalorder %s28_s19, 2  ;;  %s37_s20 = sadd.s32 1, %s541_s14 }
   0x6   : > { %p44_p1 = scmp.ne.s32.totalorder %s541_s14, %s537_s13  ;;  %p45_p2 = scmp.eq.s32.totalorder %s553_s17, 0 }
   0x7   : > { %s685_s19 = smov (%p30_p0, %s28_s19), 0  ;;  %p50_p4 = scmp.ne.s32.totalorder %s537_s13, %s533_s12 }
   0x8   : > { %p615_p3 = por %p45_p2, %p44_p1  ;;  %s32_s22 = ssub.s32 %s549_s16, %s685_s19 }
   0x9   : > { %p51_p5 = scmp.eq.s32.totalorder %s389_s18, 0  ;;  %p35_p6 = scmp.eq.s32.totalorder %s32_s22, 0 }
   0xa   : > { %p410_p8 = scmp.lt.s32.totalorder %s553_s17, 2  ;;  %s150_s25 = sand.u32 1, %s541_s14  }
   0xb   : > { %p622_p7 = por %p51_p5, %p50_p4  ;;  %s402_s26 = sshll.u32 %s549_s16, 3 }
   0xc   : > { %s628_s24 = scalar_select %p35_p6, %s541_s14, %s37_s20  }
   0xd   : > { %s393_s27 = sshll.u32 %s150_s25, 3  ;;  %s161_s30 = scalar_lea.hbm %s673_s0, %s402_s26 }
   0xe   : > { %s163_s4 = sshll.u32 %s161_s30, 4  ;;  %s154_s5 = scalar_lea.vmem [#allocation2], %s393_s27  ;;  %s164_s4 = int_to_ptr.hbm [resolvable:$true] %s163_s4 }
   0xf   : > { %s165_s6 = sshll.u32 %s154_s5, 4  ;;  %p407_p9 = pnand %p410_p8, %p615_p3  ;;  %s166_s6 = int_to_ptr.vmem [resolvable:$true] %s165_s6 }
  0x10   : > { %p396_p10 = scmp.ge.s32.totalorder %s553_s17, 1  ;;  %p170_p11 = scmp.lt.s32.totalorder %s553_s17, 3 }
  0x11   : > { %s151_s7 = scalar_lea.sflag [#allocation3], %s150_s25 }
  0x12   : > { %409 = dma.hbm_to_vmem [thread:$0]  (!%p407_p9), %s164_s4, 128, %s166_s6, %s151_s7  }
  0x13   : > { %p171_p12 = pnand %p396_p10, %p170_p11 }
  0x14   : > { %s176_s8 = sand.u32 (!%p171_p12), 1, %s537_s13  }
  0x15   : > { %174 = sbr.rel (%p171_p12) target bundleno = 174 (0xae), region = 32  ;;  %s397_s9 = sshll.u32 (!%p171_p12), %s176_s8, 3 }
  0x16   : > { %s177_s10 = scalar_lea.sflag (!%p171_p12), [#allocation3], %s176_s8  ;;  %s180_s11 = scalar_lea.vmem (!%p171_p12), [#allocation2], %s397_s9 }
  0x1a   : > { %528 = dma.done.wait (%p622_p7), %s177_s10, 128  }
  0x1b   : > { %530 = vsyncadd (%p622_p7), %s177_s10, 4294967168  ;;  %v555_v0 = vmov 0   ;;  %v556_v1 = vmov 2   ;;  %v219_v2 = vld [vmem:[%s674_s1] sm:$0x7]  ;;  %v557_v4 = vmov 1  }
  0x1c   : > { %463 = vset.pattern.permute.xlu0 %v555_v0  ;;  %465 = vset.pattern.permute.xlu1 %v556_v1  ;;  %v220_v3 = vld [vmem:[%s675_s2] sm:$0x7]  ;;  %v558_v5 = vmov 3   ;;  %p210_p13 = scmp.lt.s32.totalorder %s545_s15, 1  ;;  %vm290_vm0 = vcmask 1043456  }
  0x1d   : > { %467 = vset.pattern.permute.xlu2 %v555_v0  ;;  %224 = vperm.xlu0 %463, %v219_v2   ;;  %v221_v6 = vld [vmem:[%s180_s11] sm:$0xff] }
  0x1e   : > { %251 = vperm.xlu1 %465, %v219_v2   ;;  %280 = vperm.xlu2 %467, %v220_v3   ;;  %v228_v9 = vperm.slane %v221_v6, 0  ;;  %v229_v10 = vperm.slane %v221_v6, 4  ;;  %v240_v11 = vperm.slane %v221_v6, 1  ;;  %v241_v12 = vperm.slane %v221_v6, 5  ;;  %s687_s15 = smov (!%p210_p13, %s545_s15), 1 }
  0x1f   : > { %v254_v13 = vperm.slane %v221_v6, 2  ;;  %v255_v14 = vperm.slane %v221_v6, 6  ;;  %v268_v15 = vperm.slane %v221_v6, 3  ;;  %v269_v16 = vperm.slane %v221_v6, 7  ;;  %s403_s22 = sshll.u32 %s687_s15, 3 }
  0x20   : > { %v232_v17 = vperm.slane %v228_v9, 0  ;;  %v233_v18 = vperm.slane %v229_v10, 0  ;;  %v244_v19 = vperm.slane %v240_v11, 1  ;;  %v245_v20 = vperm.slane %v241_v12, 1  ;;  %s217_s26 = scalar_lea.vmem %s676_s3, %s403_s22 }
  0x21   : > { %v258_v21 = vperm.slane %v254_v13, 2  ;;  %v259_v22 = vperm.slane %v255_v14, 2  ;;  %v272_v23 = vperm.slane %v268_v15, 3  ;;  %v273_v24 = vperm.slane %v269_v16, 3 }
  0x25   : > { %464 = vset.pattern.permute.xlu0 %v557_v4 }
  0x26   : > { %466 = vset.pattern.permute.xlu1 %v558_v5  ;;  %237 = vperm.xlu0 %464, %v219_v2  }
  0x27   : > { %265 = vperm.xlu1 %466, %v219_v2  }
  0x2e   : > { %468 = vset.pattern.permute.xlu0 %v555_v0 }
  0x78   : > { %v281_v39 = vpop.permute.xlu2 %280 }
  0x8f   : > { %v225_v7 = vpop.permute.xlu0 %224 }
  0x90   : > { %v252_v8 = vpop.permute.xlu1 %251  ;;  %v234_v27 = vmul.f32 %v232_v17, %v225_v7  ;;  %v235_v28 = vmul.f32 %v233_v18, %v225_v7 }
  0x91   : > { %v260_v31 = vmul.f32 %v258_v21, %v252_v8  ;;  %v261_v32 = vmul.f32 %v259_v22, %v252_v8 }
  0x98   : > { %v238_v25 = vpop.permute.xlu0 %237 }
  0x99   : > { %v266_v26 = vpop.permute.xlu1 %265  ;;  %v246_v29 = vmul.f32 %v244_v19, %v238_v25  ;;  %v247_v30 = vmul.f32 %v245_v20, %v238_v25 }
  0x9a   : > { %v274_v35 = vmul.f32 %v272_v23, %v266_v26  ;;  %v275_v36 = vmul.f32 %v273_v24, %v266_v26 }
  0x9b   : > { %v248_v33 = vadd.f32 %v246_v29, %v234_v27  ;;  %v249_v34 = vadd.f32 %v247_v30, %v235_v28 }
  0x9d   : > { %v262_v37 = vadd.f32 %v260_v31, %v248_v33  ;;  %v263_v38 = vadd.f32 %v261_v32, %v249_v34 }
  0x9f   : > { %v276_v40 = vadd.f32 %v274_v35, %v262_v37  ;;  %v277_v41 = vadd.f32 %v275_v36, %v263_v38 }
  0xa1   : > { %v284_v42 = vadd.f32 %v281_v39, %v277_v41  ;;  %v283_v43 = vadd.f32 %v281_v39, %v276_v40 }
  0xa3   : > { %469 = vtanh.f32 %v284_v42 }
  0xa4   : > { %471 = vtanh.f32 %v283_v43 }
  0xa9   : > { %v470_v44 = vpop.eup %469 }
  0xaa   : > { %v289_v45 = vrot.slane %v470_v44, 4  ;;  %v472_v46 = vpop.eup %471 }
  0xac   : > { %v291_v47 = vsel %vm290_vm0, %v472_v46, %v289_v45 }
  0xad   : > { %293 = vst [vmem:[%s217_s26] sm:$0x77] %v291_v47 }
  0xae PF: > { %s16_s17 = sadd.s32 1, %s553_s17   ;;  %s679_s12 = smov %s537_s13 }
  0xaf   : > { %p13_p0 = scmp.ge.s32.totalorder %s16_s17, 4   ;;  %s680_s13 = smov %s541_s14 }
  0xb0   : > { %s681_s14 = smov %s628_s24  ;;  %s682_s15 = smov %s549_s16 }
  0xb1   : > { %s683_s16 = smov %s685_s19  ;;  %15 = sbr.rel (!%p13_p0) target bundleno = 4 (0x4), region = 72 }
  0xb6   :  { %324 = vsyncpa [#allocation3], 1 }
  0xb7   :  { %326 = vsyncpa [#allocation3 + $0x1], 1 }

</bundles_post_ra>
